<compile_context>
chip_gen: v7x
topology: tpu7x:2x2x1
jax: 0.10.0
libtpu: 0.0.40
codegen_flags: <defaults>
</compile_context>

<pallas_src>
import functools

import jax
import jax.numpy as jnp
import numpy as np
from jax.experimental import pallas as pl
from jax.experimental.pallas import tpu as pltpu


def _round_up(x, m):
    return (x + m - 1) // m * m


def _plan_tiles(n):
    """Return (n_pad, tm, tk) for the aggregation grid."""
    n_pad = _round_up(n, 256)
    if n_pad <= 1024:
        # Small-graph fast path: one grid step per layer (A fits VMEM; no pipeline
        # overhead, which would dominate at this size).
        return n_pad, n_pad, n_pad
    # Large path: pick big tiles first, then pad N up to a multiple of lcm(tm, tk)=tk.
    # Extra padded rows/cols of A are zero and cheap.  n_pad//tm is a multiple of 4,
    # so the "parallel" row axis splits evenly across v7x's two TensorCores.
    tm, tk = 512, 2048
    n_pad = _round_up(n, tk)
    return n_pad, tm, tk


# ---------------------------------------------------------------------------
# Kernel 1: per-node linear  H = x @ W + b   (f32 compute, bf16 output)
# ---------------------------------------------------------------------------
def _linear_kernel(x_ref, w_ref, b_ref, h_ref):
    h = jnp.dot(x_ref[...], w_ref[...], preferred_element_type=jnp.float32)
    h_ref[...] = (h + b_ref[...]).astype(h_ref.dtype)


def _linear(x, w, b, *, tm):
    n_pad, cin = x.shape
    cout = w.shape[1]
    return pl.pallas_call(
        _linear_kernel,
        out_shape=jax.ShapeDtypeStruct((n_pad, cout), jnp.bfloat16),
        grid_spec=pltpu.PrefetchScalarGridSpec(
            num_scalar_prefetch=0,
            grid=(n_pad // tm,),
            in_specs=[
                pl.BlockSpec((tm, cin), lambda i: (i, 0)),      # node rows
                pl.BlockSpec((cin, cout), lambda i: (0, 0)),    # weight (small, resident)
                pl.BlockSpec((1, cout), lambda i: (0, 0)),      # bias   (small, resident)
            ],
            out_specs=pl.BlockSpec((tm, cout), lambda i: (i, 0)),
        ),
        compiler_params=pltpu.CompilerParams(
            dimension_semantics=("parallel",)),
    )(x, w, b)


# ---------------------------------------------------------------------------
# Kernel 2: aggregation  out = epilogue(A @ H)   (bf16 x bf16 MXU, f32 accumulation)
# ---------------------------------------------------------------------------
def _agg_kernel(a_ref, h_ref, o_ref, *, tk, epilogue, valid_cols):
    k = pl.program_id(1)

    @pl.when(k == 0)
    def _():
        o_ref[...] = jnp.zeros_like(o_ref)

    # Slice the k-chunk out of the VMEM-resident H slab (DMA'd from HBM exactly once).
    off = pl.multiple_of(k * tk, tk)
    h_blk = h_ref[pl.ds(off, tk), :]                       # bf16 (tk, C)
    # bf16 x bf16 on the MXU, f32 accumulation directly in the resident output block.
    o_ref[...] += jnp.dot(a_ref[...], h_blk, preferred_element_type=jnp.float32)

    @pl.when(k == pl.num_programs(1) - 1)
    def _():
        acc = o_ref[...]
        if epilogue == "relu":
            o_ref[...] = jnp.maximum(acc, 0.0)
        else:  # masked log_softmax over the first `valid_cols` (logical) lanes
            lane = jax.lax.broadcasted_iota(jnp.int32, acc.shape, 1)
            z = jnp.where(lane < valid_cols, acc, jnp.float32(-1e30))
            m = jnp.max(z, axis=-1, keepdims=True)
            lse = jnp.log(jnp.sum(jnp.exp(z - m), axis=-1, keepdims=True))
            o_ref[...] = (z - m) - lse


def _aggregate(a_bf16, h_bf16, *, epilogue, valid_cols, tm, tk):
    n_pad = a_bf16.shape[0]
    c = h_bf16.shape[1]

    # Explicit scoped-VMEM budget: A tiles (double-buffered, bf16) + resident H slab
    # (budgeted for 2 buffers) + output block (double-buffered, f32) + headroom.
    vmem_bytes = int(2 * tm * tk * 2
                     + 2 * n_pad * c * 2
                     + 2 * tm * c * 4
                     + (8 << 20))

    kernel = functools.partial(_agg_kernel, tk=tk,
                               epilogue=epilogue, valid_cols=valid_cols)

    return pl.pallas_call(
        kernel,
        out_shape=jax.ShapeDtypeStruct((n_pad, c), jnp.float32),
        grid_spec=pltpu.PrefetchScalarGridSpec(
            num_scalar_prefetch=0,
            grid=(n_pad // tm, n_pad // tk),
            in_specs=[
                pl.BlockSpec((tm, tk), lambda i, k: (i, k)),     # A tile (bf16), dominant stream
                pl.BlockSpec((n_pad, c), lambda i, k: (0, 0)),   # H slab, VMEM-resident
            ],
            out_specs=pl.BlockSpec((tm, c), lambda i, k: (i, 0)),
        ),
        compiler_params=pltpu.CompilerParams(
            dimension_semantics=("parallel", "arbitrary"),
            vmem_limit_bytes=vmem_bytes,
        ),
    )(a_bf16, h_bf16)


# ---------------------------------------------------------------------------
# Forward pass
# ---------------------------------------------------------------------------
def hgcn_forward(x, edge_index, params):
    """x: [N, Cin] float32, edge_index: [2, E] int32 -> [N, Cout] log-probs."""
    N, Cin = x.shape
    H = params["w1"].shape[1]
    Cout = params["w2"].shape[1]

    n_pad, tm, tk = _plan_tiles(N)
    h_pad = _round_up(H, 128)
    cout_pad = _round_up(Cout, 128)

    # Dense aggregation matrix A[target, source] with self loops, stored in bf16.
    # bf16 stores integers exactly up to 256; real graphs (multiplicity ~1 + self loop)
    # are far below that.  Padded rows/cols are zero.
    src, tgt = edge_index[0], edge_index[1]
    A = jnp.zeros((n_pad, n_pad), jnp.float32).at[tgt, src].add(1.0)
    A = A.at[jnp.arange(N), jnp.arange(N)].add(1.0)
    A = A.astype(jnp.bfloat16)

    x_pad = jnp.pad(x.astype(jnp.float32), ((0, n_pad - N), (0, 0)))

    # Fold the curvature scale into the (padded) weights/biases:
    #   c * (A @ (x W + b)) == A @ (x (cW) + (cb))
    c1 = -jnp.abs(params["curv1"]).astype(jnp.float32)
    c2 = -jnp.abs(params["curv2"]).astype(jnp.float32)
    w1 = jnp.pad(params["w1"].astype(jnp.float32) * c1, ((0, 0), (0, h_pad - H)))
    b1 = jnp.pad(params["b1"].astype(jnp.float32) * c1,
                 ((0, h_pad - H),)).reshape(1, h_pad)
    w2 = jnp.pad(params["w2"].astype(jnp.float32) * c2,
                 ((0, h_pad - H), (0, cout_pad - Cout)))
    b2 = jnp.pad(params["b2"].astype(jnp.float32) * c2,
                 ((0, cout_pad - Cout),)).reshape(1, cout_pad)

    # Layer 1: relu(A @ (x W1' + b1'))
    h1_lin = _linear(x_pad, w1, b1, tm=tm)                        # bf16 [n_pad, h_pad]
    h1 = _aggregate(A, h1_lin, epilogue="relu",
                    valid_cols=h_pad, tm=tm, tk=tk)               # f32  [n_pad, h_pad]

    # Layer 2: log_softmax(A @ (h1 W2' + b2'))  (softmax masked to the logical Cout lanes)
    h2_lin = _linear(h1, w2, b2, tm=tm)                           # bf16 [n_pad, cout_pad]
    out_pad = _aggregate(A, h2_lin, epilogue="log_softmax",
                         valid_cols=Cout, tm=tm, tk=tk)           # f32  [n_pad, cout_pad]
    return out_pad[:N, :Cout]


def init_params(key, in_channels, hidden_channels, out_channels):
    """Deterministic parameter init (uniform, like nn.Linear's bounded-uniform)."""
    ks = jax.random.split(key, 8)

    def lin(kw, kb, fan_in, fan_out):
        bound = 1.0 / np.sqrt(fan_in)
        w = jax.random.uniform(kw, (fan_in, fan_out), jnp.float32, -bound, bound)
        b = jax.random.uniform(kb, (fan_out,), jnp.float32, -bound, bound)
        return w, b

    w1, b1 = lin(ks[0], ks[1], in_channels, hidden_channels)
    w2, b2 = lin(ks[2], ks[3], hidden_channels, out_channels)
    # attention_linear params (shape parity only — softmax over [E,1] makes them a no-op)
    att_w1, att_b1 = lin(ks[4], ks[5], 2 * hidden_channels, 1)
    att_w2, att_b2 = lin(ks[6], ks[7], 2 * out_channels, 1)
    return {
        "w1": w1, "b1": b1,
        "w2": w2, "b2": b2,
        "curv1": jnp.array(-1.0, jnp.float32),
        "curv2": jnp.array(-1.0, jnp.float32),
        "att_w1": att_w1, "att_b1": att_b1,
        "att_w2": att_w2, "att_b2": att_b2,
    }


def hgcn_reference(x, edge_index, params):
    """Pure-JAX f32 reference for validation."""
    N = x.shape[0]
    src, tgt = edge_index[0], edge_index[1]
    A = jnp.zeros((N, N), jnp.float32).at[tgt, src].add(1.0) + jnp.eye(N, dtype=jnp.float32)
    c1 = -jnp.abs(params["curv1"])
    c2 = -jnp.abs(params["curv2"])
    h1 = jnp.maximum((A @ (x @ params["w1"] + params["b1"])) * c1, 0.0)
    h2 = (A @ (h1 @ params["w2"] + params["b2"])) * c2
    return jax.nn.log_softmax(h2, axis=1)


if __name__ == "__main__":
    key = jax.random.PRNGKey(0)
    k_x, k_e, k_p = jax.random.split(key, 3)

    N = 600            # nodes (padded to 768 -> single-block fast path per layer)
    E = 3000           # edges
    in_channels = 16
    hidden_channels = 32
    out_channels = 8

    x = jax.random.normal(k_x, (N, in_channels), jnp.float32)
    edge_index = jax.random.randint(k_e, (2, E), 0, N, jnp.int32)
    params = init_params(k_p, in_channels, hidden_channels, out_channels)

    out = jax.block_until_ready(hgcn_forward(x, edge_index, params))

    ref = jax.block_until_ready(hgcn_reference(x, edge_index, params))
    # H (= xW+b) feeds the MXU in bf16 (f32 accumulation), so tolerance is relaxed
    # relative to the pure-f32 reference (~0.2% per-operand rounding).
    np.testing.assert_allclose(np.asarray(out), np.asarray(ref), rtol=2e-2, atol=5e-2)

    print("KERNEL_OK")
</pallas_src>

<mosaic_0001>
module attributes {stable_mosaic.version = 11 : i64} {
  func.func @_linear_kernel(%arg0: i32, %arg1: memref<768x16xf32, #tpu.memory_space<vmem>>, %arg2: memref<16x128xf32, #tpu.memory_space<vmem>>, %arg3: memref<1x128xf32, #tpu.memory_space<vmem>>, %arg4: memref<768x128xbf16, #tpu.memory_space<vmem>>) attributes {dimension_semantics = [#tpu.dimension_semantics<parallel>], iteration_bounds = array<i64: 1>, scalar_prefetch = 0 : i64, scratch_operands = 0 : i64, tpu.core_type = #tpu.core_type<tc>, window_params = [{transform_indices = @transform_0, window_bounds = array<i64: 768, 16>}, {pipeline_mode = #tpu.pipeline_mode<synchronous>, transform_indices = @transform_1, window_bounds = array<i64: 16, 128>}, {pipeline_mode = #tpu.pipeline_mode<synchronous>, transform_indices = @transform_2, window_bounds = array<i64: 1, 128>}, {transform_indices = @transform_3, window_bounds = array<i64: 768, 128>}]} {
    %c0 = arith.constant 0 : index
    %c0_0 = arith.constant 0 : index
    %0 = vector.load %arg1[%c0, %c0_0] : memref<768x16xf32, #tpu.memory_space<vmem>>, vector<768x16xf32>
    %c0_1 = arith.constant 0 : index
    %c0_2 = arith.constant 0 : index
    %1 = vector.load %arg2[%c0_1, %c0_2] : memref<16x128xf32, #tpu.memory_space<vmem>>, vector<16x128xf32>
    %cst = arith.constant dense<0.000000e+00> : vector<768x128xf32>
    %2 = tpu.matmul %0, %1, %cst {dimension_numbers = #tpu.dot_dimension_numbers<[1], [0], [0], [1], [0, 0, 1, 1], [], []>} : vector<768x16xf32>, vector<16x128xf32>, vector<768x128xf32> -> vector<768x128xf32>
    %c0_3 = arith.constant 0 : index
    %c0_4 = arith.constant 0 : index
    %3 = vector.load %arg3[%c0_3, %c0_4] : memref<1x128xf32, #tpu.memory_space<vmem>>, vector<1x128xf32>
    %4 = vector.broadcast %3 : vector<1x128xf32> to vector<768x128xf32>
    %5 = arith.addf %2, %4 : vector<768x128xf32>
    %6 = arith.truncf %5 : vector<768x128xf32> to vector<768x128xbf16>
    %c0_5 = arith.constant 0 : index
    %c0_6 = arith.constant 0 : index
    %7 = vector.load %arg4[%c0_5, %c0_6] : memref<768x128xbf16, #tpu.memory_space<vmem>>, vector<768x128xbf16>
    tpu.vector_store %arg4[%c0_5, %c0_6], %6 {strides = array<i32>} : memref<768x128xbf16, #tpu.memory_space<vmem>>, vector<768x128xbf16>,
    return
  }
  func.func @transform_0(%arg0: i32) -> (i32, i32) {
    %c0_i32 = arith.constant 0 : i32
    %c0_i32_0 = arith.constant 0 : i32
    return %arg0, %c0_i32 : i32, i32
  }
  func.func @transform_1(%arg0: i32) -> (i32, i32) {
    %c0_i32 = arith.constant 0 : i32
    %c0_i32_0 = arith.constant 0 : i32
    %c0_i32_1 = arith.constant 0 : i32
    return %c0_i32, %c0_i32_0 : i32, i32
  }
  func.func @transform_2(%arg0: i32) -> (i32, i32) {
    %c0_i32 = arith.constant 0 : i32
    %c0_i32_0 = arith.constant 0 : i32
    %c0_i32_1 = arith.constant 0 : i32
    return %c0_i32, %c0_i32_0 : i32, i32
  }
  func.func @transform_3(%arg0: i32) -> (i32, i32) {
    %c0_i32 = arith.constant 0 : i32
    %c0_i32_0 = arith.constant 0 : i32
    return %arg0, %c0_i32 : i32, i32
  }
}

</mosaic_0001>

<bundles_post_ra>
// kernel: tpu_custom_call.1
= control target key start
LH: loop header
LB: loop body
LE: loop exit
PB: predicated region body
PF: predicated region fallthrough
CT: control target
= control target key end

     0   :  { %vm120_vm0 = vcmask 130048   ;;  %s2831_s0 = inlined_call_operand.vmem [shape: f32[768,16], index: 0, kind: input, shape index: {}]   ;;  %s2832_s1 = inlined_call_operand.vmem [shape: f32[16,128], index: 1, kind: input, shape index: {}]   ;;  %s2833_s2 = inlined_call_operand.vmem [shape: f32[1,128], index: 2, kind: input, shape index: {}]   ;;  %s2834_s3 = inlined_call_operand.hbm [shape: bf16[768,128], index: 3, kind: output, shape index: {}]  }
   0x1   :  { %v111_v0 = vld [vmem:[%s2832_s1] sm:$0xff]  ;;  %v112_v1 = vld [vmem:[%s2832_s1 + $0x8] sm:$0xff]  ;;  %v17_v7 = vld [vmem:[%s2831_s0 + $0x10] sm:$0xff] }
   0x2   :  { %v15_v2 = vld [vmem:[%s2831_s0] sm:$0xff]  ;;  %v2272_v3 = vpack.c.bf16 %v112_v1, %v111_v0  ;;  %v16_v5 = vld [vmem:[%s2831_s0 + $0x8] sm:$0xff]  ;;  %v65_v8 = vld [vmem:[%s2831_s0 + $0x190] sm:$0xff] }
   0x3   :  { %2128 = vmatprep.mubr.msk.f32.mxu0 %vm120_vm0, %v15_v2  ;;  %v63_v4 = vld [vmem:[%s2831_s0 + $0x180] sm:$0xff]  ;;  %v64_v6 = vld [vmem:[%s2831_s0 + $0x188] sm:$0xff]  ;;  %v18_v9 = vld [vmem:[%s2831_s0 + $0x18] sm:$0xff] }
   0x4   :  { %2200 = vmatprep.mubr.msk.f32.mxu1 %vm120_vm0, %v63_v4  ;;  %2273 = vmatprep.subr.bf16.mxu0 %v2272_v3  ;;  %v66_v10 = vld [vmem:[%s2831_s0 + $0x198] sm:$0xff]  ;;  %v19_v11 = vld [vmem:[%s2831_s0 + $0x20] sm:$0xff]  ;;  %v20_v13 = vld [vmem:[%s2831_s0 + $0x28] sm:$0xff] }
   0x5   :  { %2276 = vmatprep.subr.bf16.mxu1 %v2272_v3  ;;  %2275 = vmatpush3.bf16.msra.mxu0 %v2272_v3  ;;  %v67_v12 = vld [vmem:[%s2831_s0 + $0x1a0] sm:$0xff]  ;;  %v68_v14 = vld [vmem:[%s2831_s0 + $0x1a8] sm:$0xff]  ;;  %v21_v15 = vld [vmem:[%s2831_s0 + $0x30] sm:$0xff] }
   0x6   :  { %2277 = vmatpush3.bf16.msra.mxu1 %v2272_v3  ;;  %v69_v16 = vld [vmem:[%s2831_s0 + $0x1b0] sm:$0xff]  ;;  %v22_v17 = vld [vmem:[%s2831_s0 + $0x38] sm:$0xff]  ;;  %v23_v19 = vld [vmem:[%s2831_s0 + $0x40] sm:$0xff] }
   0x7   :  { %v70_v18 = vld [vmem:[%s2831_s0 + $0x1b8] sm:$0xff]  ;;  %v71_v20 = vld [vmem:[%s2831_s0 + $0x1c0] sm:$0xff]  ;;  %v24_v21 = vld [vmem:[%s2831_s0 + $0x48] sm:$0xff] }
   0x8   :  { %2129 = vmatmul.mubr.msk.f32.vlgmr.msra.gmra.mrb[0].mxu0 %vm120_vm0, %v16_v5  ;;  %v72_v22 = vld [vmem:[%s2831_s0 + $0x1c8] sm:$0xff]  ;;  %v25_v23 = vld [vmem:[%s2831_s0 + $0x50] sm:$0xff]  ;;  %v26_v25 = vld [vmem:[%s2831_s0 + $0x58] sm:$0xff] }
   0x9   :  { %2201 = vmatmul.mubr.msk.f32.vlgmr.msra.gmra.mrb[0].mxu1 %vm120_vm0, %v64_v6  ;;  %2131 = vmatprep.mubr.msk.f32.mxu0 %vm120_vm0, %v17_v7  ;;  %v73_v24 = vld [vmem:[%s2831_s0 + $0x1d0] sm:$0xff]  ;;  %v74_v26 = vld [vmem:[%s2831_s0 + $0x1d8] sm:$0xff]  ;;  %v27_v27 = vld [vmem:[%s2831_s0 + $0x60] sm:$0xff] }
   0xa   :  { %2203 = vmatprep.mubr.msk.f32.mxu1 %vm120_vm0, %v65_v8  ;;  %v75_v28 = vld [vmem:[%s2831_s0 + $0x1e0] sm:$0xff]  ;;  %v28_v29 = vld [vmem:[%s2831_s0 + $0x68] sm:$0xff]  ;;  %v29_v31 = vld [vmem:[%s2831_s0 + $0x70] sm:$0xff] }
   0xb   :  { %v76_v30 = vld [vmem:[%s2831_s0 + $0x1e8] sm:$0xff]  ;;  %v77_v32 = vld [vmem:[%s2831_s0 + $0x1f0] sm:$0xff]  ;;  %v30_v33 = vld [vmem:[%s2831_s0 + $0x78] sm:$0xff] }
   0xc   :  { %2132 = vmatmul.mubr.msk.f32.gmra.mrb[2].mxu0 %vm120_vm0, %v18_v9  ;;  %v78_v34 = vld [vmem:[%s2831_s0 + $0x1f8] sm:$0xff] }
   0xd   :  { %2204 = vmatmul.mubr.msk.f32.gmra.mrb[2].mxu1 %vm120_vm0, %v66_v10  ;;  %2134 = vmatprep.mubr.msk.f32.mxu0 %vm120_vm0, %v19_v11 }
   0xe   :  { %2206 = vmatprep.mubr.msk.f32.mxu1 %vm120_vm0, %v67_v12 }
  0x10   :  { %2135 = vmatmul.mubr.msk.f32.gmra.mrb[4].mxu0 %vm120_vm0, %v20_v13 }
  0x11   :  { %2207 = vmatmul.mubr.msk.f32.gmra.mrb[4].mxu1 %vm120_vm0, %v68_v14  ;;  %2137 = vmatprep.mubr.msk.f32.mxu0 %vm120_vm0, %v21_v15 }
  0x12   :  { %2209 = vmatprep.mubr.msk.f32.mxu1 %vm120_vm0, %v69_v16 }
  0x14   :  { %2138 = vmatmul.mubr.msk.f32.gmra.mrb[6].mxu0 %vm120_vm0, %v22_v17 }
  0x15   :  { %2210 = vmatmul.mubr.msk.f32.gmra.mrb[6].mxu1 %vm120_vm0, %v70_v18  ;;  %2140 = vmatprep.mubr.msk.f32.mxu0 %vm120_vm0, %v23_v19 }
  0x16   :  { %2212 = vmatprep.mubr.msk.f32.mxu1 %vm120_vm0, %v71_v20 }
  0x18   :  { %2141 = vmatmul.mubr.msk.f32.gmra.mrb[8].mxu0 %vm120_vm0, %v24_v21 }
  0x19   :  { %2213 = vmatmul.mubr.msk.f32.gmra.mrb[8].mxu1 %vm120_vm0, %v72_v22  ;;  %2143 = vmatprep.mubr.msk.f32.mxu0 %vm120_vm0, %v25_v23 }
  0x1a   :  { %2215 = vmatprep.mubr.msk.f32.mxu1 %vm120_vm0, %v73_v24 }
  0x1c   :  { %2144 = vmatmul.mubr.msk.f32.gmra.mrb[10].mxu0 %vm120_vm0, %v26_v25 }
  0x1d   :  { %2216 = vmatmul.mubr.msk.f32.gmra.mrb[10].mxu1 %vm120_vm0, %v74_v26  ;;  %2146 = vmatprep.mubr.msk.f32.mxu0 %vm120_vm0, %v27_v27 }
  0x1e   :  { %2218 = vmatprep.mubr.msk.f32.mxu1 %vm120_vm0, %v75_v28 }
  0x20   :  { %2147 = vmatmul.mubr.msk.f32.gmra.mrb[12].mxu0 %vm120_vm0, %v28_v29 }
  0x21   :  { %2219 = vmatmul.mubr.msk.f32.gmra.mrb[12].mxu1 %vm120_vm0, %v76_v30  ;;  %2149 = vmatprep.mubr.msk.f32.mxu0 %vm120_vm0, %v29_v31 }
  0x22   :  { %2221 = vmatprep.mubr.msk.f32.mxu1 %vm120_vm0, %v77_v32 }
  0x23   :  { %8 = vsyncpa [#allocation3], 0  ;;  %v31_v35 = vld [vmem:[%s2831_s0 + $0x80] sm:$0xff]  ;;  %v32_v37 = vld [vmem:[%s2831_s0 + $0x88] sm:$0xff] }
  0x24   :  { %v79_v36 = vld [vmem:[%s2831_s0 + $0x200] sm:$0xff]  ;;  %2150 = vmatmul.mubr.msk.f32.gmra.mrb[14].mxu0 %vm120_vm0, %v30_v33  ;;  %v80_v38 = vld [vmem:[%s2831_s0 + $0x208] sm:$0xff]  ;;  %v33_v39 = vld [vmem:[%s2831_s0 + $0x90] sm:$0xff] }
  0x25   :  { %2222 = vmatmul.mubr.msk.f32.gmra.mrb[14].mxu1 %vm120_vm0, %v78_v34  ;;  %2152 = vmatprep.mubr.msk.f32.mxu0 %vm120_vm0, %v31_v35  ;;  %v81_v40 = vld [vmem:[%s2831_s0 + $0x210] sm:$0xff]  ;;  %v34_v41 = vld [vmem:[%s2831_s0 + $0x98] sm:$0xff]  ;;  %v35_v43 = vld [vmem:[%s2831_s0 + $0xa0] sm:$0xff] }
  0x26   :  { %2224 = vmatprep.mubr.msk.f32.mxu1 %vm120_vm0, %v79_v36  ;;  %v82_v42 = vld [vmem:[%s2831_s0 + $0x218] sm:$0xff]  ;;  %v83_v44 = vld [vmem:[%s2831_s0 + $0x220] sm:$0xff]  ;;  %v36_v45 = vld [vmem:[%s2831_s0 + $0xa8] sm:$0xff] }
  0x27   :  { %v84_v46 = vld [vmem:[%s2831_s0 + $0x228] sm:$0xff]  ;;  %v37_v47 = vld [vmem:[%s2831_s0 + $0xb0] sm:$0xff]  ;;  %v38_v49 = vld [vmem:[%s2831_s0 + $0xb8] sm:$0xff] }
  0x28   :  { %2153 = vmatmul.mubr.msk.f32.gmra.mrb[16].mxu0 %vm120_vm0, %v32_v37  ;;  %v85_v48 = vld [vmem:[%s2831_s0 + $0x230] sm:$0xff]  ;;  %v86_v50 = vld [vmem:[%s2831_s0 + $0x238] sm:$0xff]  ;;  %v39_v51 = vld [vmem:[%s2831_s0 + $0xc0] sm:$0xff] }
  0x29   :  { %2225 = vmatmul.mubr.msk.f32.gmra.mrb[16].mxu1 %vm120_vm0, %v80_v38  ;;  %2155 = vmatprep.mubr.msk.f32.mxu0 %vm120_vm0, %v33_v39  ;;  %v87_v52 = vld [vmem:[%s2831_s0 + $0x240] sm:$0xff]  ;;  %v40_v53 = vld [vmem:[%s2831_s0 + $0xc8] sm:$0xff]  ;;  %v41_v55 = vld [vmem:[%s2831_s0 + $0xd0] sm:$0xff] }
  0x2a   :  { %2227 = vmatprep.mubr.msk.f32.mxu1 %vm120_vm0, %v81_v40  ;;  %v88_v54 = vld [vmem:[%s2831_s0 + $0x248] sm:$0xff]  ;;  %v89_v56 = vld [vmem:[%s2831_s0 + $0x250] sm:$0xff]  ;;  %v42_v57 = vld [vmem:[%s2831_s0 + $0xd8] sm:$0xff] }
  0x2b   :  { %v90_v58 = vld [vmem:[%s2831_s0 + $0x258] sm:$0xff]  ;;  %v43_v59 = vld [vmem:[%s2831_s0 + $0xe0] sm:$0xff]  ;;  %v44_v61 = vld [vmem:[%s2831_s0 + $0xe8] sm:$0xff] }
  0x2c   :  { %2156 = vmatmul.mubr.msk.f32.gmra.mrb[18].mxu0 %vm120_vm0, %v34_v41  ;;  %v91_v60 = vld [vmem:[%s2831_s0 + $0x260] sm:$0xff]  ;;  %v92_v62 = vld [vmem:[%s2831_s0 + $0x268] sm:$0xff]  ;;  %v45_v63 = vld [vmem:[%s2831_s0 + $0xf0] sm:$0xff] }
  0x2d   :  { %2228 = vmatmul.mubr.msk.f32.gmra.mrb[18].mxu1 %vm120_vm0, %v82_v42  ;;  %2158 = vmatprep.mubr.msk.f32.mxu0 %vm120_vm0, %v35_v43  ;;  %v93_v0 = vld [vmem:[%s2831_s0 + $0x270] sm:$0xff]  ;;  %v46_v1 = vld [vmem:[%s2831_s0 + $0xf8] sm:$0xff]  ;;  %v47_v3 = vld [vmem:[%s2831_s0 + $0x100] sm:$0xff] }
  0x2e   :  { %2230 = vmatprep.mubr.msk.f32.mxu1 %vm120_vm0, %v83_v44  ;;  %v94_v2 = vld [vmem:[%s2831_s0 + $0x278] sm:$0xff]  ;;  %v95_v4 = vld [vmem:[%s2831_s0 + $0x280] sm:$0xff]  ;;  %v48_v5 = vld [vmem:[%s2831_s0 + $0x108] sm:$0xff] }
  0x2f   :  { %v96_v6 = vld [vmem:[%s2831_s0 + $0x288] sm:$0xff]  ;;  %v49_v7 = vld [vmem:[%s2831_s0 + $0x110] sm:$0xff]  ;;  %v50_v9 = vld [vmem:[%s2831_s0 + $0x118] sm:$0xff] }
  0x30   :  { %2159 = vmatmul.mubr.msk.f32.gmra.mrb[20].mxu0 %vm120_vm0, %v36_v45  ;;  %v97_v8 = vld [vmem:[%s2831_s0 + $0x290] sm:$0xff]  ;;  %v98_v10 = vld [vmem:[%s2831_s0 + $0x298] sm:$0xff]  ;;  %v51_v11 = vld [vmem:[%s2831_s0 + $0x120] sm:$0xff] }
  0x31   :  { %2231 = vmatmul.mubr.msk.f32.gmra.mrb[20].mxu1 %vm120_vm0, %v84_v46  ;;  %2161 = vmatprep.mubr.msk.f32.mxu0 %vm120_vm0, %v37_v47  ;;  %v99_v12 = vld [vmem:[%s2831_s0 + $0x2a0] sm:$0xff]  ;;  %v52_v13 = vld [vmem:[%s2831_s0 + $0x128] sm:$0xff]  ;;  %v53_v15 = vld [vmem:[%s2831_s0 + $0x130] sm:$0xff] }
  0x32   :  { %2233 = vmatprep.mubr.msk.f32.mxu1 %vm120_vm0, %v85_v48  ;;  %v100_v14 = vld [vmem:[%s2831_s0 + $0x2a8] sm:$0xff]  ;;  %v101_v16 = vld [vmem:[%s2831_s0 + $0x2b0] sm:$0xff]  ;;  %v54_v17 = vld [vmem:[%s2831_s0 + $0x138] sm:$0xff] }
  0x33   :  { %v102_v18 = vld [vmem:[%s2831_s0 + $0x2b8] sm:$0xff]  ;;  %v55_v19 = vld [vmem:[%s2831_s0 + $0x140] sm:$0xff]  ;;  %v56_v21 = vld [vmem:[%s2831_s0 + $0x148] sm:$0xff] }
  0x34   :  { %2162 = vmatmul.mubr.msk.f32.gmra.mrb[22].mxu0 %vm120_vm0, %v38_v49  ;;  %v103_v20 = vld [vmem:[%s2831_s0 + $0x2c0] sm:$0xff]  ;;  %v104_v22 = vld [vmem:[%s2831_s0 + $0x2c8] sm:$0xff]  ;;  %v57_v23 = vld [vmem:[%s2831_s0 + $0x150] sm:$0xff] }
  0x35   :  { %2234 = vmatmul.mubr.msk.f32.gmra.mrb[22].mxu1 %vm120_vm0, %v86_v50  ;;  %2164 = vmatprep.mubr.msk.f32.mxu0 %vm120_vm0, %v39_v51  ;;  %v105_v24 = vld [vmem:[%s2831_s0 + $0x2d0] sm:$0xff]  ;;  %v58_v25 = vld [vmem:[%s2831_s0 + $0x158] sm:$0xff]  ;;  %v59_v27 = vld [vmem:[%s2831_s0 + $0x160] sm:$0xff] }
  0x36   :  { %2236 = vmatprep.mubr.msk.f32.mxu1 %vm120_vm0, %v87_v52  ;;  %v106_v26 = vld [vmem:[%s2831_s0 + $0x2d8] sm:$0xff]  ;;  %v107_v28 = vld [vmem:[%s2831_s0 + $0x2e0] sm:$0xff]  ;;  %v60_v29 = vld [vmem:[%s2831_s0 + $0x168] sm:$0xff] }
  0x37   :  { %v108_v30 = vld [vmem:[%s2831_s0 + $0x2e8] sm:$0xff]  ;;  %v61_v31 = vld [vmem:[%s2831_s0 + $0x170] sm:$0xff]  ;;  %v62_v33 = vld [vmem:[%s2831_s0 + $0x178] sm:$0xff] }
  0x38   :  { %2165 = vmatmul.mubr.msk.f32.gmra.mrb[24].mxu0 %vm120_vm0, %v40_v53  ;;  %v109_v32 = vld [vmem:[%s2831_s0 + $0x2f0] sm:$0xff]  ;;  %v110_v34 = vld [vmem:[%s2831_s0 + $0x2f8] sm:$0xff]  ;;  %v2721_v35 = vld [vmem:[%s2833_s2] ss:$0 sm:$0xff]  ;;  %s2305_s0 = smov [#allocation2]  }
  0x39   :  { %2237 = vmatmul.mubr.msk.f32.gmra.mrb[24].mxu1 %vm120_vm0, %v88_v54  ;;  %2167 = vmatprep.mubr.msk.f32.mxu0 %vm120_vm0, %v41_v55  ;;  %s1439_s2 = sshll.u32 %s2305_s0, 4  ;;  %s1440_s2 = int_to_ptr.vmem [resolvable:$true] %s1439_s2 }
  0x3a   :  { %2239 = vmatprep.mubr.msk.f32.mxu1 %vm120_vm0, %v89_v56  ;;  %s2281_s14 = scalar_lea.vmem %s1440_s2, 6144  ;;  %p2286_p1 = scmp.lt.s32.totalorder %s1440_s2, %s1440_s2 }
  0x3b   :  { %p2282_p0 = scmp.ne.s32.totalorder %s1440_s2, %s2281_s14  ;;  %p2287_p2 = scmp.lt.s32.totalorder %s2281_s14, %s2281_s14 }
  0x3c   :  { %2168 = vmatmul.mubr.msk.f32.gmra.mrb[26].mxu0 %vm120_vm0, %v42_v57 }
  0x3d   :  { %2240 = vmatmul.mubr.msk.f32.gmra.mrb[26].mxu1 %vm120_vm0, %v90_v58  ;;  %2170 = vmatprep.mubr.msk.f32.mxu0 %vm120_vm0, %v43_v59  ;;  %p2288_p3 = por %p2287_p2, %p2286_p1 }
  0x3e   :  { %2242 = vmatprep.mubr.msk.f32.mxu1 %vm120_vm0, %v91_v60 }
  0x3f   :  { %p2289_p4 = pnand %p2288_p3, %p2282_p0 }
  0x40   :  { %2171 = vmatmul.mubr.msk.f32.gmra.mrb[28].mxu0 %vm120_vm0, %v44_v61 }
  0x41   :  { %2243 = vmatmul.mubr.msk.f32.gmra.mrb[28].mxu1 %vm120_vm0, %v92_v62  ;;  %2173 = vmatprep.mubr.msk.f32.mxu0 %vm120_vm0, %v45_v63 }
  0x42   :  { %2245 = vmatprep.mubr.msk.f32.mxu1 %vm120_vm0, %v93_v0 }
  0x44   :  { %2174 = vmatmul.mubr.msk.f32.gmra.mrb[30].mxu0 %vm120_vm0, %v46_v1 }
  0x45   :  { %2246 = vmatmul.mubr.msk.f32.gmra.mrb[30].mxu1 %vm120_vm0, %v94_v2  ;;  %2176 = vmatprep.mubr.msk.f32.mxu0 %vm120_vm0, %v47_v3 }
  0x46   :  { %2248 = vmatprep.mubr.msk.f32.mxu1 %vm120_vm0, %v95_v4 }
  0x48   :  { %2177 = vmatmul.mubr.msk.f32.gmra.mrb[32].mxu0 %vm120_vm0, %v48_v5 }
  0x49   :  { %2249 = vmatmul.mubr.msk.f32.gmra.mrb[32].mxu1 %vm120_vm0, %v96_v6  ;;  %2179 = vmatprep.mubr.msk.f32.mxu0 %vm120_vm0, %v49_v7 }
  0x4a   :  { %2251 = vmatprep.mubr.msk.f32.mxu1 %vm120_vm0, %v97_v8 }
  0x4c   :  { %2180 = vmatmul.mubr.msk.f32.gmra.mrb[34].mxu0 %vm120_vm0, %v50_v9 }
  0x4d   :  { %2252 = vmatmul.mubr.msk.f32.gmra.mrb[34].mxu1 %vm120_vm0, %v98_v10  ;;  %2182 = vmatprep.mubr.msk.f32.mxu0 %vm120_vm0, %v51_v11 }
  0x4e   :  { %2254 = vmatprep.mubr.msk.f32.mxu1 %vm120_vm0, %v99_v12 }
  0x50   :  { %2183 = vmatmul.mubr.msk.f32.gmra.mrb[36].mxu0 %vm120_vm0, %v52_v13 }
  0x51   :  { %2255 = vmatmul.mubr.msk.f32.gmra.mrb[36].mxu1 %vm120_vm0, %v100_v14  ;;  %2185 = vmatprep.mubr.msk.f32.mxu0 %vm120_vm0, %v53_v15 }
  0x52   :  { %2257 = vmatprep.mubr.msk.f32.mxu1 %vm120_vm0, %v101_v16 }
  0x54   :  { %2186 = vmatmul.mubr.msk.f32.gmra.mrb[38].mxu0 %vm120_vm0, %v54_v17 }
  0x55   :  { %2258 = vmatmul.mubr.msk.f32.gmra.mrb[38].mxu1 %vm120_vm0, %v102_v18  ;;  %2188 = vmatprep.mubr.msk.f32.mxu0 %vm120_vm0, %v55_v19 }
  0x56   :  { %2260 = vmatprep.mubr.msk.f32.mxu1 %vm120_vm0, %v103_v20 }
  0x58   :  { %2189 = vmatmul.mubr.msk.f32.gmra.mrb[40].mxu0 %vm120_vm0, %v56_v21 }
  0x59   :  { %2261 = vmatmul.mubr.msk.f32.gmra.mrb[40].mxu1 %vm120_vm0, %v104_v22  ;;  %2191 = vmatprep.mubr.msk.f32.mxu0 %vm120_vm0, %v57_v23 }
  0x5a   :  { %2263 = vmatprep.mubr.msk.f32.mxu1 %vm120_vm0, %v105_v24 }
  0x5c   :  { %2192 = vmatmul.mubr.msk.f32.gmra.mrb[42].mxu0 %vm120_vm0, %v58_v25 }
  0x5d   :  { %2264 = vmatmul.mubr.msk.f32.gmra.mrb[42].mxu1 %vm120_vm0, %v106_v26  ;;  %2194 = vmatprep.mubr.msk.f32.mxu0 %vm120_vm0, %v59_v27 }
  0x5e   :  { %2266 = vmatprep.mubr.msk.f32.mxu1 %vm120_vm0, %v107_v28 }
  0x60   :  { %2195 = vmatmul.mubr.msk.f32.gmra.mrb[44].mxu0 %vm120_vm0, %v60_v29 }
  0x61   :  { %2267 = vmatmul.mubr.msk.f32.gmra.mrb[44].mxu1 %vm120_vm0, %v108_v30  ;;  %2197 = vmatprep.mubr.msk.f32.mxu0 %vm120_vm0, %v61_v31 }
  0x62   :  { %2269 = vmatprep.mubr.msk.f32.mxu1 %vm120_vm0, %v109_v32 }
  0x64   :  { %2198 = vmatmul.mubr.msk.f32.gmra.mrb[46].mxu0 %vm120_vm0, %v62_v33 }
  0x65   :  { %2270 = vmatmul.mubr.msk.f32.gmra.mrb[46].mxu1 %vm120_vm0, %v110_v34 }
  0xdb   :  { %v2130_v36 = vpop.f32.mrb[0].mxu0 }
  0xdc   :  { %v2202_v37 = vpop.f32.mrb[0].mxu1  ;;  %v481_v38 = vadd.f32 %v2130_v36, %v2721_v35  ;;  %v475_v40 = vpop.f32.mrb[1].mxu0 }
  0xdd   :  { %v721_v39 = vadd.f32 %v2202_v37, %v2721_v35  ;;  %v715_v41 = vpop.f32.mrb[1].mxu1  ;;  %v476_v42 = vadd.f32 %v2721_v35, %v475_v40 }
  0xde   :  { %v716_v43 = vadd.f32 %v2721_v35, %v715_v41 }
  0xdf   :  { %v1742_v44 = vpack.c.bf16 %v481_v38, %v476_v42  ;;  %v2133_v46 = vpop.f32.mrb[2].mxu0 }
  0xe0   :  { %v1862_v45 = vpack.c.bf16 %v721_v39, %v716_v43  ;;  %v2205_v47 = vpop.f32.mrb[2].mxu1  ;;  %v491_v48 = vadd.f32 %v2133_v46, %v2721_v35  ;;  %v485_v50 = vpop.f32.mrb[3].mxu0 }
  0xe1   :  { %v731_v49 = vadd.f32 %v2205_v47, %v2721_v35  ;;  %v725_v51 = vpop.f32.mrb[3].mxu1  ;;  %1743 = vst [vmem:[#allocation2] sm:$0xff] %v1742_v44   ;;  %v486_v52 = vadd.f32 %v2721_v35, %v485_v50 }
  0xe2   :  { %2002 = vst [vmem:[#allocation2 + $0xc0] sm:$0xff] %v1862_v45   ;;  %v726_v53 = vadd.f32 %v2721_v35, %v725_v51 }
  0xe3   :  { %v1747_v54 = vpack.c.bf16 %v491_v48, %v486_v52  ;;  %v2136_v56 = vpop.f32.mrb[4].mxu0 }
  0xe4   :  { %v1867_v55 = vpack.c.bf16 %v731_v49, %v726_v53  ;;  %v2208_v57 = vpop.f32.mrb[4].mxu1  ;;  %v501_v58 = vadd.f32 %v2136_v56, %v2721_v35  ;;  %v495_v60 = vpop.f32.mrb[5].mxu0 }
  0xe5   :  { %v741_v59 = vadd.f32 %v2208_v57, %v2721_v35  ;;  %v735_v61 = vpop.f32.mrb[5].mxu1  ;;  %1979 = vst [vmem:[#allocation2 + $0x8] sm:$0xff] %v1747_v54   ;;  %v496_v62 = vadd.f32 %v2721_v35, %v495_v60 }
  0xe6   :  { %2003 = vst [vmem:[#allocation2 + $0xc8] sm:$0xff] %v1867_v55   ;;  %v736_v63 = vadd.f32 %v2721_v35, %v735_v61 }
  0xe7   :  { %v1752_v0 = vpack.c.bf16 %v501_v58, %v496_v62  ;;  %v2139_v2 = vpop.f32.mrb[6].mxu0 }
  0xe8   :  { %v1872_v1 = vpack.c.bf16 %v741_v59, %v736_v63  ;;  %v2211_v3 = vpop.f32.mrb[6].mxu1  ;;  %v511_v4 = vadd.f32 %v2139_v2, %v2721_v35  ;;  %v505_v6 = vpop.f32.mrb[7].mxu0 }
  0xe9   :  { %v751_v5 = vadd.f32 %v2211_v3, %v2721_v35  ;;  %v745_v7 = vpop.f32.mrb[7].mxu1  ;;  %1980 = vst [vmem:[#allocation2 + $0x10] sm:$0xff] %v1752_v0   ;;  %v506_v8 = vadd.f32 %v2721_v35, %v505_v6 }
  0xea   :  { %2004 = vst [vmem:[#allocation2 + $0xd0] sm:$0xff] %v1872_v1   ;;  %v746_v9 = vadd.f32 %v2721_v35, %v745_v7 }
  0xeb   :  { %v1757_v10 = vpack.c.bf16 %v511_v4, %v506_v8  ;;  %v2142_v12 = vpop.f32.mrb[8].mxu0 }
  0xec   :  { %v1877_v11 = vpack.c.bf16 %v751_v5, %v746_v9  ;;  %v2214_v13 = vpop.f32.mrb[8].mxu1  ;;  %v521_v14 = vadd.f32 %v2142_v12, %v2721_v35  ;;  %v515_v16 = vpop.f32.mrb[9].mxu0 }
  0xed   :  { %v761_v15 = vadd.f32 %v2214_v13, %v2721_v35  ;;  %v755_v17 = vpop.f32.mrb[9].mxu1  ;;  %1981 = vst [vmem:[#allocation2 + $0x18] sm:$0xff] %v1757_v10   ;;  %v516_v18 = vadd.f32 %v2721_v35, %v515_v16 }
  0xee   :  { %2005 = vst [vmem:[#allocation2 + $0xd8] sm:$0xff] %v1877_v11   ;;  %v756_v19 = vadd.f32 %v2721_v35, %v755_v17 }
  0xef   :  { %v1762_v20 = vpack.c.bf16 %v521_v14, %v516_v18  ;;  %v2145_v22 = vpop.f32.mrb[10].mxu0 }
  0xf0   :  { %v1882_v21 = vpack.c.bf16 %v761_v15, %v756_v19  ;;  %v2217_v23 = vpop.f32.mrb[10].mxu1  ;;  %v531_v24 = vadd.f32 %v2145_v22, %v2721_v35  ;;  %v525_v26 = vpop.f32.mrb[11].mxu0 }
  0xf1   :  { %v771_v25 = vadd.f32 %v2217_v23, %v2721_v35  ;;  %v765_v27 = vpop.f32.mrb[11].mxu1  ;;  %1982 = vst [vmem:[#allocation2 + $0x20] sm:$0xff] %v1762_v20   ;;  %v526_v28 = vadd.f32 %v2721_v35, %v525_v26 }
  0xf2   :  { %2006 = vst [vmem:[#allocation2 + $0xe0] sm:$0xff] %v1882_v21   ;;  %v766_v29 = vadd.f32 %v2721_v35, %v765_v27 }
  0xf3   :  { %v1767_v30 = vpack.c.bf16 %v531_v24, %v526_v28  ;;  %v2148_v32 = vpop.f32.mrb[12].mxu0 }
  0xf4   :  { %v1887_v31 = vpack.c.bf16 %v771_v25, %v766_v29  ;;  %v2220_v33 = vpop.f32.mrb[12].mxu1  ;;  %v541_v34 = vadd.f32 %v2148_v32, %v2721_v35  ;;  %v535_v37 = vpop.f32.mrb[13].mxu0 }
  0xf5   :  { %v781_v36 = vadd.f32 %v2220_v33, %v2721_v35  ;;  %v775_v38 = vpop.f32.mrb[13].mxu1  ;;  %1983 = vst [vmem:[#allocation2 + $0x28] sm:$0xff] %v1767_v30   ;;  %v536_v39 = vadd.f32 %v2721_v35, %v535_v37 }
  0xf6   :  { %2007 = vst [vmem:[#allocation2 + $0xe8] sm:$0xff] %v1887_v31   ;;  %v776_v40 = vadd.f32 %v2721_v35, %v775_v38 }
  0xf7   :  { %v1772_v41 = vpack.c.bf16 %v541_v34, %v536_v39  ;;  %v2151_v43 = vpop.f32.mrb[14].mxu0 }
  0xf8   :  { %v1892_v42 = vpack.c.bf16 %v781_v36, %v776_v40  ;;  %v2223_v44 = vpop.f32.mrb[14].mxu1  ;;  %v551_v45 = vadd.f32 %v2151_v43, %v2721_v35  ;;  %v545_v47 = vpop.f32.mrb[15].mxu0 }
  0xf9   :  { %v791_v46 = vadd.f32 %v2223_v44, %v2721_v35  ;;  %v785_v48 = vpop.f32.mrb[15].mxu1  ;;  %1984 = vst [vmem:[#allocation2 + $0x30] sm:$0xff] %v1772_v41   ;;  %v546_v49 = vadd.f32 %v2721_v35, %v545_v47 }
  0xfa   :  { %2008 = vst [vmem:[#allocation2 + $0xf0] sm:$0xff] %v1892_v42   ;;  %v786_v50 = vadd.f32 %v2721_v35, %v785_v48 }
  0xfb   :  { %v1777_v51 = vpack.c.bf16 %v551_v45, %v546_v49  ;;  %v2154_v53 = vpop.f32.mrb[16].mxu0 }
  0xfc   :  { %v1897_v52 = vpack.c.bf16 %v791_v46, %v786_v50  ;;  %v2226_v54 = vpop.f32.mrb[16].mxu1  ;;  %v561_v55 = vadd.f32 %v2154_v53, %v2721_v35  ;;  %v555_v57 = vpop.f32.mrb[17].mxu0 }
  0xfd   :  { %v801_v56 = vadd.f32 %v2226_v54, %v2721_v35  ;;  %v795_v58 = vpop.f32.mrb[17].mxu1  ;;  %1985 = vst [vmem:[#allocation2 + $0x38] sm:$0xff] %v1777_v51   ;;  %v556_v59 = vadd.f32 %v2721_v35, %v555_v57 }
  0xfe   :  { %2009 = vst [vmem:[#allocation2 + $0xf8] sm:$0xff] %v1897_v52   ;;  %v796_v60 = vadd.f32 %v2721_v35, %v795_v58 }
  0xff   :  { %v1782_v61 = vpack.c.bf16 %v561_v55, %v556_v59  ;;  %v2157_v63 = vpop.f32.mrb[18].mxu0 }
 0x100   :  { %v1902_v62 = vpack.c.bf16 %v801_v56, %v796_v60  ;;  %v2229_v0 = vpop.f32.mrb[18].mxu1  ;;  %v571_v1 = vadd.f32 %v2157_v63, %v2721_v35  ;;  %v565_v3 = vpop.f32.mrb[19].mxu0 }
 0x101   :  { %v811_v2 = vadd.f32 %v2229_v0, %v2721_v35  ;;  %v805_v4 = vpop.f32.mrb[19].mxu1  ;;  %1986 = vst [vmem:[#allocation2 + $0x40] sm:$0xff] %v1782_v61   ;;  %v566_v5 = vadd.f32 %v2721_v35, %v565_v3 }
 0x102   :  { %2010 = vst [vmem:[#allocation2 + $0x100] sm:$0xff] %v1902_v62   ;;  %v806_v6 = vadd.f32 %v2721_v35, %v805_v4 }
 0x103   :  { %v1787_v7 = vpack.c.bf16 %v571_v1, %v566_v5  ;;  %v2160_v9 = vpop.f32.mrb[20].mxu0 }
 0x104   :  { %v1907_v8 = vpack.c.bf16 %v811_v2, %v806_v6  ;;  %v2232_v10 = vpop.f32.mrb[20].mxu1  ;;  %v581_v11 = vadd.f32 %v2160_v9, %v2721_v35  ;;  %v575_v13 = vpop.f32.mrb[21].mxu0 }
 0x105   :  { %v821_v12 = vadd.f32 %v2232_v10, %v2721_v35  ;;  %v815_v14 = vpop.f32.mrb[21].mxu1  ;;  %1987 = vst [vmem:[#allocation2 + $0x48] sm:$0xff] %v1787_v7   ;;  %v576_v15 = vadd.f32 %v2721_v35, %v575_v13 }
 0x106   :  { %2011 = vst [vmem:[#allocation2 + $0x108] sm:$0xff] %v1907_v8   ;;  %v816_v16 = vadd.f32 %v2721_v35, %v815_v14 }
 0x107   :  { %v1792_v17 = vpack.c.bf16 %v581_v11, %v576_v15  ;;  %v2163_v19 = vpop.f32.mrb[22].mxu0 }
 0x108   :  { %v1912_v18 = vpack.c.bf16 %v821_v12, %v816_v16  ;;  %v2235_v20 = vpop.f32.mrb[22].mxu1  ;;  %v591_v21 = vadd.f32 %v2163_v19, %v2721_v35  ;;  %v585_v23 = vpop.f32.mrb[23].mxu0 }
 0x109   :  { %v831_v22 = vadd.f32 %v2235_v20, %v2721_v35  ;;  %v825_v24 = vpop.f32.mrb[23].mxu1  ;;  %1988 = vst [vmem:[#allocation2 + $0x50] sm:$0xff] %v1792_v17   ;;  %v586_v25 = vadd.f32 %v2721_v35, %v585_v23 }
 0x10a   :  { %2012 = vst [vmem:[#allocation2 + $0x110] sm:$0xff] %v1912_v18   ;;  %v826_v26 = vadd.f32 %v2721_v35, %v825_v24 }
 0x10b   :  { %v1797_v27 = vpack.c.bf16 %v591_v21, %v586_v25  ;;  %v2166_v29 = vpop.f32.mrb[24].mxu0 }
 0x10c   :  { %v1917_v28 = vpack.c.bf16 %v831_v22, %v826_v26  ;;  %v2238_v30 = vpop.f32.mrb[24].mxu1  ;;  %v601_v31 = vadd.f32 %v2166_v29, %v2721_v35  ;;  %v595_v33 = vpop.f32.mrb[25].mxu0 }
 0x10d   :  { %v841_v32 = vadd.f32 %v2238_v30, %v2721_v35  ;;  %v835_v34 = vpop.f32.mrb[25].mxu1  ;;  %1989 = vst [vmem:[#allocation2 + $0x58] sm:$0xff] %v1797_v27   ;;  %v596_v36 = vadd.f32 %v2721_v35, %v595_v33 }
 0x10e   :  { %2013 = vst [vmem:[#allocation2 + $0x118] sm:$0xff] %v1917_v28   ;;  %v836_v37 = vadd.f32 %v2721_v35, %v835_v34 }
 0x10f   :  { %v1802_v38 = vpack.c.bf16 %v601_v31, %v596_v36  ;;  %v2169_v40 = vpop.f32.mrb[26].mxu0 }
 0x110   :  { %v1922_v39 = vpack.c.bf16 %v841_v32, %v836_v37  ;;  %v2241_v41 = vpop.f32.mrb[26].mxu1  ;;  %v611_v42 = vadd.f32 %v2169_v40, %v2721_v35  ;;  %v605_v44 = vpop.f32.mrb[27].mxu0 }
 0x111   :  { %v851_v43 = vadd.f32 %v2241_v41, %v2721_v35  ;;  %v845_v45 = vpop.f32.mrb[27].mxu1  ;;  %1990 = vst [vmem:[#allocation2 + $0x60] sm:$0xff] %v1802_v38   ;;  %v606_v46 = vadd.f32 %v2721_v35, %v605_v44 }
 0x112   :  { %2014 = vst [vmem:[#allocation2 + $0x120] sm:$0xff] %v1922_v39   ;;  %v846_v47 = vadd.f32 %v2721_v35, %v845_v45 }
 0x113   :  { %v1807_v48 = vpack.c.bf16 %v611_v42, %v606_v46  ;;  %v2172_v50 = vpop.f32.mrb[28].mxu0 }
 0x114   :  { %v1927_v49 = vpack.c.bf16 %v851_v43, %v846_v47  ;;  %v2244_v51 = vpop.f32.mrb[28].mxu1  ;;  %v621_v52 = vadd.f32 %v2172_v50, %v2721_v35  ;;  %v615_v54 = vpop.f32.mrb[29].mxu0 }
 0x115   :  { %v861_v53 = vadd.f32 %v2244_v51, %v2721_v35  ;;  %v855_v55 = vpop.f32.mrb[29].mxu1  ;;  %1991 = vst [vmem:[#allocation2 + $0x68] sm:$0xff] %v1807_v48   ;;  %v616_v56 = vadd.f32 %v2721_v35, %v615_v54 }
 0x116   :  { %2015 = vst [vmem:[#allocation2 + $0x128] sm:$0xff] %v1927_v49   ;;  %v856_v57 = vadd.f32 %v2721_v35, %v855_v55 }
 0x117   :  { %v1812_v58 = vpack.c.bf16 %v621_v52, %v616_v56  ;;  %v2175_v60 = vpop.f32.mrb[30].mxu0 }
 0x118   :  { %v1932_v59 = vpack.c.bf16 %v861_v53, %v856_v57  ;;  %v2247_v61 = vpop.f32.mrb[30].mxu1  ;;  %v631_v62 = vadd.f32 %v2175_v60, %v2721_v35  ;;  %v625_v0 = vpop.f32.mrb[31].mxu0 }
 0x119   :  { %v871_v63 = vadd.f32 %v2247_v61, %v2721_v35  ;;  %v865_v1 = vpop.f32.mrb[31].mxu1  ;;  %1992 = vst [vmem:[#allocation2 + $0x70] sm:$0xff] %v1812_v58   ;;  %v626_v2 = vadd.f32 %v2721_v35, %v625_v0 }
 0x11a   :  { %2016 = vst [vmem:[#allocation2 + $0x130] sm:$0xff] %v1932_v59   ;;  %v866_v3 = vadd.f32 %v2721_v35, %v865_v1 }
 0x11b   :  { %v1817_v4 = vpack.c.bf16 %v631_v62, %v626_v2  ;;  %v2178_v6 = vpop.f32.mrb[32].mxu0 }
 0x11c   :  { %v1937_v5 = vpack.c.bf16 %v871_v63, %v866_v3  ;;  %v2250_v7 = vpop.f32.mrb[32].mxu1  ;;  %v641_v8 = vadd.f32 %v2178_v6, %v2721_v35  ;;  %v635_v10 = vpop.f32.mrb[33].mxu0 }
 0x11d   :  { %v881_v9 = vadd.f32 %v2250_v7, %v2721_v35  ;;  %v875_v11 = vpop.f32.mrb[33].mxu1  ;;  %1993 = vst [vmem:[#allocation2 + $0x78] sm:$0xff] %v1817_v4   ;;  %v636_v12 = vadd.f32 %v2721_v35, %v635_v10 }
 0x11e   :  { %2017 = vst [vmem:[#allocation2 + $0x138] sm:$0xff] %v1937_v5   ;;  %v876_v13 = vadd.f32 %v2721_v35, %v875_v11 }
 0x11f   :  { %v1822_v14 = vpack.c.bf16 %v641_v8, %v636_v12  ;;  %v2181_v16 = vpop.f32.mrb[34].mxu0 }
 0x120   :  { %v1942_v15 = vpack.c.bf16 %v881_v9, %v876_v13  ;;  %v2253_v17 = vpop.f32.mrb[34].mxu1  ;;  %v651_v18 = vadd.f32 %v2181_v16, %v2721_v35  ;;  %v645_v20 = vpop.f32.mrb[35].mxu0 }
 0x121   :  { %v891_v19 = vadd.f32 %v2253_v17, %v2721_v35  ;;  %v885_v21 = vpop.f32.mrb[35].mxu1  ;;  %1994 = vst [vmem:[#allocation2 + $0x80] sm:$0xff] %v1822_v14   ;;  %v646_v22 = vadd.f32 %v2721_v35, %v645_v20 }
 0x122   :  { %2018 = vst [vmem:[#allocation2 + $0x140] sm:$0xff] %v1942_v15   ;;  %v886_v23 = vadd.f32 %v2721_v35, %v885_v21 }
 0x123   :  { %v1827_v24 = vpack.c.bf16 %v651_v18, %v646_v22  ;;  %v2184_v26 = vpop.f32.mrb[36].mxu0 }
 0x124   :  { %v1947_v25 = vpack.c.bf16 %v891_v19, %v886_v23  ;;  %v2256_v27 = vpop.f32.mrb[36].mxu1  ;;  %v661_v28 = vadd.f32 %v2184_v26, %v2721_v35  ;;  %v655_v30 = vpop.f32.mrb[37].mxu0 }
 0x125   :  { %v901_v29 = vadd.f32 %v2256_v27, %v2721_v35  ;;  %v895_v31 = vpop.f32.mrb[37].mxu1  ;;  %1995 = vst [vmem:[#allocation2 + $0x88] sm:$0xff] %v1827_v24   ;;  %v656_v32 = vadd.f32 %v2721_v35, %v655_v30 }
 0x126   :  { %2019 = vst [vmem:[#allocation2 + $0x148] sm:$0xff] %v1947_v25   ;;  %v896_v33 = vadd.f32 %v2721_v35, %v895_v31 }
 0x127   :  { %v1832_v34 = vpack.c.bf16 %v661_v28, %v656_v32  ;;  %v2187_v37 = vpop.f32.mrb[38].mxu0 }
 0x128   :  { %v1952_v36 = vpack.c.bf16 %v901_v29, %v896_v33  ;;  %v2259_v38 = vpop.f32.mrb[38].mxu1  ;;  %v671_v39 = vadd.f32 %v2187_v37, %v2721_v35  ;;  %v665_v41 = vpop.f32.mrb[39].mxu0 }
 0x129   :  { %v911_v40 = vadd.f32 %v2259_v38, %v2721_v35  ;;  %v905_v42 = vpop.f32.mrb[39].mxu1  ;;  %1996 = vst [vmem:[#allocation2 + $0x90] sm:$0xff] %v1832_v34   ;;  %v666_v43 = vadd.f32 %v2721_v35, %v665_v41 }
 0x12a   :  { %2020 = vst [vmem:[#allocation2 + $0x150] sm:$0xff] %v1952_v36   ;;  %v906_v44 = vadd.f32 %v2721_v35, %v905_v42 }
 0x12b   :  { %v1837_v45 = vpack.c.bf16 %v671_v39, %v666_v43  ;;  %v2190_v47 = vpop.f32.mrb[40].mxu0 }
 0x12c   :  { %v1957_v46 = vpack.c.bf16 %v911_v40, %v906_v44  ;;  %v2262_v48 = vpop.f32.mrb[40].mxu1  ;;  %v681_v49 = vadd.f32 %v2190_v47, %v2721_v35  ;;  %v675_v51 = vpop.f32.mrb[41].mxu0 }
 0x12d   :  { %v921_v50 = vadd.f32 %v2262_v48, %v2721_v35  ;;  %v915_v52 = vpop.f32.mrb[41].mxu1  ;;  %1997 = vst [vmem:[#allocation2 + $0x98] sm:$0xff] %v1837_v45   ;;  %v676_v53 = vadd.f32 %v2721_v35, %v675_v51 }
 0x12e   :  { %2021 = vst [vmem:[#allocation2 + $0x158] sm:$0xff] %v1957_v46   ;;  %v916_v54 = vadd.f32 %v2721_v35, %v915_v52 }
 0x12f   :  { %v1842_v55 = vpack.c.bf16 %v681_v49, %v676_v53  ;;  %v2193_v57 = vpop.f32.mrb[42].mxu0 }
 0x130   :  { %v1962_v56 = vpack.c.bf16 %v921_v50, %v916_v54  ;;  %v2265_v58 = vpop.f32.mrb[42].mxu1  ;;  %v691_v59 = vadd.f32 %v2193_v57, %v2721_v35  ;;  %v685_v61 = vpop.f32.mrb[43].mxu0 }
 0x131   :  { %v931_v60 = vadd.f32 %v2265_v58, %v2721_v35  ;;  %v925_v62 = vpop.f32.mrb[43].mxu1  ;;  %1998 = vst [vmem:[#allocation2 + $0xa0] sm:$0xff] %v1842_v55   ;;  %v686_v63 = vadd.f32 %v2721_v35, %v685_v61 }
 0x132   :  { %2022 = vst [vmem:[#allocation2 + $0x160] sm:$0xff] %v1962_v56   ;;  %v926_v0 = vadd.f32 %v2721_v35, %v925_v62 }
 0x133   :  { %v1847_v1 = vpack.c.bf16 %v691_v59, %v686_v63  ;;  %v2196_v3 = vpop.f32.mrb[44].mxu0 }
 0x134   :  { %v1967_v2 = vpack.c.bf16 %v931_v60, %v926_v0  ;;  %v2268_v4 = vpop.f32.mrb[44].mxu1  ;;  %v701_v5 = vadd.f32 %v2196_v3, %v2721_v35  ;;  %v695_v7 = vpop.f32.mrb[45].mxu0 }
 0x135   :  { %v941_v6 = vadd.f32 %v2268_v4, %v2721_v35  ;;  %v935_v8 = vpop.f32.mrb[45].mxu1  ;;  %1999 = vst [vmem:[#allocation2 + $0xa8] sm:$0xff] %v1847_v1   ;;  %v696_v9 = vadd.f32 %v2721_v35, %v695_v7 }
 0x136   :  { %2023 = vst [vmem:[#allocation2 + $0x168] sm:$0xff] %v1967_v2   ;;  %v936_v10 = vadd.f32 %v2721_v35, %v935_v8 }
 0x137   :  { %v1852_v11 = vpack.c.bf16 %v701_v5, %v696_v9  ;;  %v2199_v13 = vpop.f32.mrb[46].mxu0 }
 0x138   :  { %v1972_v12 = vpack.c.bf16 %v941_v6, %v936_v10  ;;  %v2271_v14 = vpop.f32.mrb[46].mxu1  ;;  %v711_v15 = vadd.f32 %v2199_v13, %v2721_v35  ;;  %v705_v17 = vpop.f32.mrb[47].mxu0 }
 0x139   :  { %v951_v16 = vadd.f32 %v2271_v14, %v2721_v35  ;;  %v945_v18 = vpop.f32.mrb[47].mxu1  ;;  %2000 = vst [vmem:[#allocation2 + $0xb0] sm:$0xff] %v1852_v11   ;;  %v706_v19 = vadd.f32 %v2721_v35, %v705_v17 }
 0x13a   :  { %2024 = vst [vmem:[#allocation2 + $0x170] sm:$0xff] %v1972_v12   ;;  %v946_v20 = vadd.f32 %v2721_v35, %v945_v18 }
 0x13b   :  { %v1857_v21 = vpack.c.bf16 %v711_v15, %v706_v19 }
 0x13c   :  { %v1977_v22 = vpack.c.bf16 %v951_v16, %v946_v20 }
 0x13d   :  { %2001 = vst [vmem:[#allocation2 + $0xb8] sm:$0xff] %v1857_v21  }
 0x13e   :  { %2025 = vst [vmem:[#allocation2 + $0x178] sm:$0xff] %v1977_v22  }
 0x13f   :  { %2292 = shalt.err (!%p2289_p4)
}
 0x140   :  { %s2293_s17 = scalar_lea.hbm %s2834_s3, 6144 }
 0x141   :  { %p2294_p5 = scmp.ne.s32.totalorder %s2834_s3, %s2293_s17  ;;  %p2297_p6 = scmp.lt.u32.totalorder %s2293_s17, %s2834_s3 }
 0x143   :  { %p2299_p7 = pnand %p2297_p6, %p2294_p5 }
 0x145   :  { %2302 = shalt.err (!%p2299_p7)
}
 0x146   :  { %s2306_s21 = smov 64   ;;  %s2307_s22 = smov 4  }
 0x147   :  { %1445 = dma.vmem_to_hbm [thread:$0]  %s1440_s2, 6144, %s2834_s3, [#allocation3], %s2306_s21, %s2306_s21, %s2307_s22  }
 0x148   :  { %2303 = dma.done.wait [#allocation3], 6144  }
 0x149   :  { %2304 = vsyncadd [#allocation3], 4294961152 }
 0x14a   :  { %1449 = vsyncpa [#allocation3], 1 }

</bundles_post_ra>
